<compile_context>
chip_gen: v6e
topology: v6e:2x2x1
jax: 0.10.0
libtpu: 0.0.40
codegen_flags: <defaults>
</compile_context>

<pallas_src>
import functools

import jax
import jax.numpy as jnp
from jax import lax
from jax.experimental import pallas as pl
from jax.experimental.pallas import tpu as pltpu

_LANE = 128
_NEG_INF = -1e30
_DEFAULT_VMEM_LIMIT = 48 * 1024 * 1024   # safe on v7x (64 MiB/TC); raise on v5e/v6e if desired


def _round_up(n, m):
    return ((n + m - 1) // m) * m


def _pad2d(a, rows, cols):
    r, c = a.shape
    if r == rows and c == cols:
        return a
    return jnp.pad(a, ((0, rows - r), (0, cols - c)))


# --------------------------------------------------------------------------
# One-time capability probe: does this jax/Mosaic accept pl.Buffered(1)
# (single-buffered, grid-invariant input)?  The probe compiles a tiny kernel
# once; the real forward is never wrapped in a try/except and is traced once.
# --------------------------------------------------------------------------
@functools.lru_cache(maxsize=None)
def _supports_single_buffer():
    if not hasattr(pl, "Buffered"):
        return False

    def _probe(w_ref, o_ref):
        o_ref[...] = w_ref[...] + 1.0

    try:
        fn = pl.pallas_call(
            _probe,
            out_shape=jax.ShapeDtypeStruct((16, 128), jnp.float32),
            grid=(2,),
            in_specs=[pl.BlockSpec((8, 128), lambda i: (0, 0),
                                   pipeline_mode=pl.Buffered(1))],
            out_specs=pl.BlockSpec((8, 128), lambda i: (i, 0)),
        )
        jax.block_until_ready(fn(jnp.ones((8, 128), jnp.float32)))
        return True
    except Exception:   # narrow scope: only the tiny probe, never the real kernel
        return False


# --------------------------------------------------------------------------
# Parameter preparation (hoisted out of the per-call path).
# --------------------------------------------------------------------------
def prepare_params(params):
    """Pad to lane-aligned shapes and cast weights to bf16 ONCE.

    Returns a dict reusable across forward calls (avoids rebuilding ~10
    pad/convert ops and an extra HBM round-trip of every weight per call).
    """
    din, h = params["w0"].shape
    c = params["w4"].shape[1]
    dp, hp, cp = _round_up(din, _LANE), _round_up(h, _LANE), _round_up(c, _LANE)

    w = (
        _pad2d(params["w0"], dp, hp).astype(jnp.bfloat16),
        _pad2d(params["w1"], hp, hp).astype(jnp.bfloat16),
        _pad2d(params["w2"], hp, hp).astype(jnp.bfloat16),
        _pad2d(params["w3"], hp, hp).astype(jnp.bfloat16),
        _pad2d(params["w4"], hp, cp).astype(jnp.bfloat16),
    )
    b = (
        _pad2d(params["b0"], 1, hp).astype(jnp.float32),
        _pad2d(params["b1"], 1, hp).astype(jnp.float32),
        _pad2d(params["b2"], 1, hp).astype(jnp.float32),
        _pad2d(params["b3"], 1, hp).astype(jnp.float32),
        _pad2d(params["b4"], 1, cp).astype(jnp.float32),
    )
    return {"w": w, "b": b, "dims": (din, h, c), "padded": (dp, hp, cp)}


# --------------------------------------------------------------------------
# Kernel: full MLP forward for one batch tile.  bf16 MXU operands, f32 acc.
# --------------------------------------------------------------------------
def _mlp_kernel(x_ref,
                w0_ref, b0_ref,
                w1_ref, b1_ref,
                w2_ref, b2_ref,
                w3_ref, b3_ref,
                w4_ref, b4_ref,
                out_ref,
                *, num_classes):
    # x arrives as f32; cast to bf16 in-kernel (free VPU work under an
    # MXU-bound kernel) so the wrapper never materializes a bf16 copy in HBM.
    x = x_ref[...].astype(jnp.bfloat16)

    def linear(h, w_ref, b_ref):
        return (jnp.dot(h, w_ref[...], preferred_element_type=jnp.float32)
                + b_ref[...])

    # Layer 0: Linear(input -> hidden) + LeakyReLU(0.01), f32 activation math.
    h = linear(x, w0_ref, b0_ref)
    h = jnp.where(h > 0, h, 0.01 * h)
    h = h.astype(jnp.bfloat16)

    # Layers 1..3: Linear(hidden -> hidden) + ReLU.  Downcast to bf16 before
    # the ReLU (max(.,0) commutes with the downcast -> identical result,
    # halves the live intermediate).
    for w_ref, b_ref in ((w1_ref, b1_ref), (w2_ref, b2_ref), (w3_ref, b3_ref)):
        h = linear(h, w_ref, b_ref).astype(jnp.bfloat16)
        h = jnp.maximum(h, 0.0)

    # Final Linear to the lane-padded class dim, f32.
    logits = linear(h, w4_ref, b4_ref)

    # Mask padded class columns so they do not perturb the softmax normalizer.
    col = lax.broadcasted_iota(jnp.int32, logits.shape, 1)
    logits = jnp.where(col < num_classes, logits, _NEG_INF)

    # log_softmax over the class axis (dim=1 of the (B, C) logits).
    m = jnp.max(logits, axis=-1, keepdims=True)
    shifted = logits - m
    lse = jnp.log(jnp.sum(jnp.exp(shifted), axis=-1, keepdims=True))
    out_ref[...] = (shifted - lse).astype(out_ref.dtype)


# --------------------------------------------------------------------------
# Batch tiling: balanced tiles, bounded padding, >=2 steps for v7x megacore.
# --------------------------------------------------------------------------
def _batch_tiling(batch, batch_tile):
    n = pl.cdiv(batch, max(batch_tile, 8))
    if batch > 8:
        n = max(n, 2)        # >=2 "parallel" steps -> both v7x TensorCores busy
    bt = _round_up(pl.cdiv(batch, n), 8)
    n = pl.cdiv(batch, bt)
    return bt, n, n * bt


def domain_discriminator_forward(x, params, *, batch_tile=256,
                                 vmem_limit_bytes=_DEFAULT_VMEM_LIMIT):
    """Pallas forward.

    x: (B, Din) f32.  `params` may be either the raw f32 param dict from
    `init_params` or (preferably) the cached output of `prepare_params` so the
    pad/cast of the weights is not redone every call.
    """
    prepared = params if "w" in params else prepare_params(params)
    w, b = prepared["w"], prepared["b"]
    din, hidden, num_classes = prepared["dims"]
    dp, hp, cp = prepared["padded"]
    del hidden, hp

    batch = x.shape[0]
    assert x.shape[1] == din, f"expected input size {din}, got {x.shape[1]}"

    bt, n_steps, bp = _batch_tiling(batch, batch_tile)

    # x stays f32; pad only if alignment requires it (Din is already a
    # multiple of 128 for the real module, so this is usually just the <8-row
    # per-tile batch pad, or nothing at all).
    if (batch, din) != (bp, dp):
        x = jnp.pad(x, ((0, bp - batch), (0, dp - din)))

    # ---- BlockSpecs ---------------------------------------------------------
    single_buffer = _supports_single_buffer()

    def const_spec(shape):
        # Grid-invariant operand (same block every step): resident in VMEM.
        if single_buffer:
            return pl.BlockSpec(shape, lambda i: (0, 0),
                                pipeline_mode=pl.Buffered(1))
        return pl.BlockSpec(shape, lambda i: (0, 0))

    in_specs = [pl.BlockSpec((bt, dp), lambda i: (i, 0))]       # x: batch-tiled
    for wi, bi in zip(w, b):
        in_specs.append(const_spec(wi.shape))
        in_specs.append(const_spec(bi.shape))
    out_spec = pl.BlockSpec((bt, cp), lambda i: (i, 0))

    # ---- cost hint for the surrounding XLA schedule -------------------------
    flops = 2 * bp * (dp * w[0].shape[1] + 3 * w[1].shape[0] * w[1].shape[1]
                      + w[4].shape[0] * cp)
    bytes_accessed = (bp * dp * 4
                      + sum(a.size * 2 for a in w)
                      + sum(a.size * 4 for a in b)
                      + bp * cp * 4)
    cost = pl.CostEstimate(flops=flops,
                           transcendentals=bp * cp,
                           bytes_accessed=bytes_accessed)

    fn = pl.pallas_call(
        functools.partial(_mlp_kernel, num_classes=num_classes),
        out_shape=jax.ShapeDtypeStruct((bp, cp), jnp.float32),
        grid_spec=pltpu.PrefetchScalarGridSpec(
            num_scalar_prefetch=0,
            grid=(n_steps,),
            in_specs=in_specs,
            out_specs=out_spec,
        ),
        compiler_params=pltpu.CompilerParams(
            dimension_semantics=("parallel",),
            vmem_limit_bytes=vmem_limit_bytes,
        ),
        cost_estimate=cost,
    )
    out = fn(x, w[0], b[0], w[1], b[1], w[2], b[2], w[3], b[3], w[4], b[4])
    if out.shape != (batch, num_classes):
        out = out[:batch, :num_classes]
    return out


def init_params(key, input_size, hidden_size, num_classes):
    """Deterministic synthetic parameters (shapes match DomainDiscriminator)."""
    ks = jax.random.split(key, 10)

    def lin(kw, kb, din, dout):
        scale = 1.0 / jnp.sqrt(jnp.float32(din))
        w = jax.random.uniform(kw, (din, dout), jnp.float32, -scale, scale)
        b = jax.random.uniform(kb, (1, dout), jnp.float32, -scale, scale)
        return w, b

    p = {}
    p["w0"], p["b0"] = lin(ks[0], ks[1], input_size, hidden_size)
    p["w1"], p["b1"] = lin(ks[2], ks[3], hidden_size, hidden_size)
    p["w2"], p["b2"] = lin(ks[4], ks[5], hidden_size, hidden_size)
    p["w3"], p["b3"] = lin(ks[6], ks[7], hidden_size, num_classes) \
        if False else lin(ks[6], ks[7], hidden_size, hidden_size)
    p["w4"], p["b4"] = lin(ks[8], ks[9], hidden_size, num_classes)
    return p


def reference_forward(x, params):
    """Pure-JAX f32 reference mirroring the PyTorch module."""
    h = x @ params["w0"] + params["b0"]
    h = jnp.where(h > 0, h, 0.01 * h)
    for i in (1, 2, 3):
        h = jnp.maximum(h @ params[f"w{i}"] + params[f"b{i}"], 0.0)
    logits = h @ params["w4"] + params["b4"]
    return jax.nn.log_softmax(logits, axis=1)


if __name__ == "__main__":
    # Small shapes consistent with the module (input_size = 2 * hidden_size,
    # 3 hidden ReLU layers, num_classes = 6).  Hidden/input lane-aligned;
    # batch_tile=8 gives a 2-step (megacore-shardable) grid.
    batch = 16
    hidden_size = 128
    input_size = 2 * hidden_size
    num_classes = 6

    key = jax.random.PRNGKey(0)
    k_x, k_p = jax.random.split(key)
    x = jax.random.normal(k_x, (batch, input_size), jnp.float32)
    params = init_params(k_p, input_size, hidden_size, num_classes)

    # Pad/cast the weights once; reuse across calls.
    prepared = prepare_params(params)

    out = domain_discriminator_forward(x, prepared, batch_tile=8)
    out = jax.block_until_ready(out)

    ref = reference_forward(x, params)
    assert out.shape == (batch, num_classes)
    max_diff = jnp.max(jnp.abs(out - ref))
    # bf16 MXU operands vs f32 reference: allow ~1e-2-level drift.
    assert jnp.allclose(out, ref, atol=3e-2, rtol=3e-2), (
        f"Pallas output mismatch vs reference (max|diff|={max_diff})")
    # log-probs must normalize: logsumexp over the real classes ~= 0.
    assert jnp.allclose(jax.nn.logsumexp(out, axis=1), 0.0, atol=1e-3)

    print("KERNEL_OK")
</pallas_src>

<mosaic_0001>
module attributes {stable_mosaic.version = 11 : i64} {
  func.func @_probe(%arg0: i32, %arg1: memref<8x128xf32, #tpu.memory_space<vmem>>, %arg2: memref<8x128xf32, #tpu.memory_space<vmem>>) attributes {dimension_semantics = [#tpu.dimension_semantics<arbitrary>], iteration_bounds = array<i64: 2>, scalar_prefetch = 0 : i64, scratch_operands = 0 : i64, tpu.core_type = #tpu.core_type<tc>, window_params = [{pipeline_mode = #tpu.pipeline_mode<synchronous>, transform_indices = @transform_0, window_bounds = array<i64: 8, 128>}, {transform_indices = @transform_1, window_bounds = array<i64: 8, 128>}]} {
    %c0 = arith.constant 0 : index
    %c0_0 = arith.constant 0 : index
    %0 = vector.load %arg1[%c0, %c0_0] : memref<8x128xf32, #tpu.memory_space<vmem>>, vector<8x128xf32>
    %cst = arith.constant 1.000000e+00 : f32
    %1 = vector.broadcast %cst : f32 to vector<8x128xf32>
    %2 = arith.addf %0, %1 : vector<8x128xf32>
    %c0_1 = arith.constant 0 : index
    %c0_2 = arith.constant 0 : index
    %3 = vector.load %arg2[%c0_1, %c0_2] : memref<8x128xf32, #tpu.memory_space<vmem>>, vector<8x128xf32>
    tpu.vector_store %arg2[%c0_1, %c0_2], %2 {strides = array<i32>} : memref<8x128xf32, #tpu.memory_space<vmem>>, vector<8x128xf32>,
    return
  }
  func.func @transform_0(%arg0: i32) -> (i32, i32) {
    %c0_i32 = arith.constant 0 : i32
    %c0_i32_0 = arith.constant 0 : i32
    %c0_i32_1 = arith.constant 0 : i32
    return %c0_i32, %c0_i32_0 : i32, i32
  }
  func.func @transform_1(%arg0: i32) -> (i32, i32) {
    %c0_i32 = arith.constant 0 : i32
    %c0_i32_0 = arith.constant 0 : i32
    return %arg0, %c0_i32 : i32, i32
  }
}

module attributes {stable_mosaic.version = 11 : i64} {
  func.func @_mlp_kernel(%arg0: i32, %arg1: memref<8x256xf32, #tpu.memory_space<vmem>>, %arg2: memref<256x128xbf16, #tpu.memory_space<vmem>>, %arg3: memref<1x128xf32, #tpu.memory_space<vmem>>, %arg4: memref<128x128xbf16, #tpu.memory_space<vmem>>, %arg5: memref<1x128xf32, #tpu.memory_space<vmem>>, %arg6: memref<128x128xbf16, #tpu.memory_space<vmem>>, %arg7: memref<1x128xf32, #tpu.memory_space<vmem>>, %arg8: memref<128x128xbf16, #tpu.memory_space<vmem>>, %arg9: memref<1x128xf32, #tpu.memory_space<vmem>>, %arg10: memref<128x128xbf16, #tpu.memory_space<vmem>>, %arg11: memref<1x128xf32, #tpu.memory_space<vmem>>, %arg12: memref<8x128xf32, #tpu.memory_space<vmem>>) attributes {dimension_semantics = [#tpu.dimension_semantics<parallel>], iteration_bounds = array<i64: 2>, scalar_prefetch = 0 : i64, scratch_operands = 0 : i64, tpu.core_type = #tpu.core_type<tc>, window_params = [{transform_indices = @transform_0, window_bounds = array<i64: 8, 256>}, {pipeline_mode = #tpu.pipeline_mode<synchronous>, transform_indices = @transform_1, window_bounds = array<i64: 256, 128>}, {pipeline_mode = #tpu.pipeline_mode<synchronous>, transform_indices = @transform_2, window_bounds = array<i64: 1, 128>}, {pipeline_mode = #tpu.pipeline_mode<synchronous>, transform_indices = @transform_3, window_bounds = array<i64: 128, 128>}, {pipeline_mode = #tpu.pipeline_mode<synchronous>, transform_indices = @transform_4, window_bounds = array<i64: 1, 128>}, {pipeline_mode = #tpu.pipeline_mode<synchronous>, transform_indices = @transform_5, window_bounds = array<i64: 128, 128>}, {pipeline_mode = #tpu.pipeline_mode<synchronous>, transform_indices = @transform_6, window_bounds = array<i64: 1, 128>}, {pipeline_mode = #tpu.pipeline_mode<synchronous>, transform_indices = @transform_7, window_bounds = array<i64: 128, 128>}, {pipeline_mode = #tpu.pipeline_mode<synchronous>, transform_indices = @transform_8, window_bounds = array<i64: 1, 128>}, {pipeline_mode = #tpu.pipeline_mode<synchronous>, transform_indices = @transform_9, window_bounds = array<i64: 128, 128>}, {pipeline_mode = #tpu.pipeline_mode<synchronous>, transform_indices = @transform_10, window_bounds = array<i64: 1, 128>}, {transform_indices = @transform_11, window_bounds = array<i64: 8, 128>}]} {
    %c0 = arith.constant 0 : index
    %c0_0 = arith.constant 0 : index
    %0 = vector.load %arg1[%c0, %c0_0] : memref<8x256xf32, #tpu.memory_space<vmem>>, vector<8x256xf32>
    %1 = arith.truncf %0 : vector<8x256xf32> to vector<8x256xbf16>
    %c0_1 = arith.constant 0 : index
    %c0_2 = arith.constant 0 : index
    %2 = vector.load %arg2[%c0_1, %c0_2] : memref<256x128xbf16, #tpu.memory_space<vmem>>, vector<256x128xbf16>
    %cst = arith.constant dense<0.000000e+00> : vector<8x128xf32>
    %3 = tpu.matmul %1, %2, %cst {dimension_numbers = #tpu.dot_dimension_numbers<[1], [0], [0], [1], [0, 0, 1, 1], [], []>} : vector<8x256xbf16>, vector<256x128xbf16>, vector<8x128xf32> -> vector<8x128xf32>
    %c0_3 = arith.constant 0 : index
    %c0_4 = arith.constant 0 : index
    %4 = vector.load %arg3[%c0_3, %c0_4] : memref<1x128xf32, #tpu.memory_space<vmem>>, vector<1x128xf32>
    %5 = vector.broadcast %4 : vector<1x128xf32> to vector<8x128xf32>
    %6 = arith.addf %3, %5 : vector<8x128xf32>
    %cst_5 = arith.constant 0.000000e+00 : f32
    %7 = vector.broadcast %cst_5 : f32 to vector<8x128xf32>
    %8 = arith.cmpf ogt, %6, %7 : vector<8x128xf32>
    %cst_6 = arith.constant 0.00999999977 : f32
    %9 = vector.broadcast %cst_6 : f32 to vector<8x128xf32>
    %10 = arith.mulf %9, %6 : vector<8x128xf32>
    %11 = arith.select %8, %6, %10 : vector<8x128xi1>, vector<8x128xf32>
    %12 = arith.truncf %11 : vector<8x128xf32> to vector<8x128xbf16>
    %c0_7 = arith.constant 0 : index
    %c0_8 = arith.constant 0 : index
    %13 = vector.load %arg4[%c0_7, %c0_8] : memref<128x128xbf16, #tpu.memory_space<vmem>>, vector<128x128xbf16>
    %cst_9 = arith.constant dense<0.000000e+00> : vector<8x128xf32>
    %14 = tpu.matmul %12, %13, %cst_9 {dimension_numbers = #tpu.dot_dimension_numbers<[1], [0], [0], [1], [0, 0, 1, 1], [], []>} : vector<8x128xbf16>, vector<128x128xbf16>, vector<8x128xf32> -> vector<8x128xf32>
    %c0_10 = arith.constant 0 : index
    %c0_11 = arith.constant 0 : index
    %15 = vector.load %arg5[%c0_10, %c0_11] : memref<1x128xf32, #tpu.memory_space<vmem>>, vector<1x128xf32>
    %16 = vector.broadcast %15 : vector<1x128xf32> to vector<8x128xf32>
    %17 = arith.addf %14, %16 : vector<8x128xf32>
    %18 = arith.truncf %17 : vector<8x128xf32> to vector<8x128xbf16>
    %cst_12 = arith.constant 0.000000e+00 : bf16
    %19 = vector.broadcast %cst_12 : bf16 to vector<8x128xbf16>
    %20 = arith.maximumf %18, %19 : vector<8x128xbf16>
    %c0_13 = arith.constant 0 : index
    %c0_14 = arith.constant 0 : index
    %21 = vector.load %arg6[%c0_13, %c0_14] : memref<128x128xbf16, #tpu.memory_space<vmem>>, vector<128x128xbf16>
    %cst_15 = arith.constant dense<0.000000e+00> : vector<8x128xf32>
    %22 = tpu.matmul %20, %21, %cst_15 {dimension_numbers = #tpu.dot_dimension_numbers<[1], [0], [0], [1], [0, 0, 1, 1], [], []>} : vector<8x128xbf16>, vector<128x128xbf16>, vector<8x128xf32> -> vector<8x128xf32>
    %c0_16 = arith.constant 0 : index
    %c0_17 = arith.constant 0 : index
    %23 = vector.load %arg7[%c0_16, %c0_17] : memref<1x128xf32, #tpu.memory_space<vmem>>, vector<1x128xf32>
    %24 = vector.broadcast %23 : vector<1x128xf32> to vector<8x128xf32>
    %25 = arith.addf %22, %24 : vector<8x128xf32>
    %26 = arith.truncf %25 : vector<8x128xf32> to vector<8x128xbf16>
    %cst_18 = arith.constant 0.000000e+00 : bf16
    %27 = vector.broadcast %cst_18 : bf16 to vector<8x128xbf16>
    %28 = arith.maximumf %26, %27 : vector<8x128xbf16>
    %c0_19 = arith.constant 0 : index
    %c0_20 = arith.constant 0 : index
    %29 = vector.load %arg8[%c0_19, %c0_20] : memref<128x128xbf16, #tpu.memory_space<vmem>>, vector<128x128xbf16>
    %cst_21 = arith.constant dense<0.000000e+00> : vector<8x128xf32>
    %30 = tpu.matmul %28, %29, %cst_21 {dimension_numbers = #tpu.dot_dimension_numbers<[1], [0], [0], [1], [0, 0, 1, 1], [], []>} : vector<8x128xbf16>, vector<128x128xbf16>, vector<8x128xf32> -> vector<8x128xf32>
    %c0_22 = arith.constant 0 : index
    %c0_23 = arith.constant 0 : index
    %31 = vector.load %arg9[%c0_22, %c0_23] : memref<1x128xf32, #tpu.memory_space<vmem>>, vector<1x128xf32>
    %32 = vector.broadcast %31 : vector<1x128xf32> to vector<8x128xf32>
    %33 = arith.addf %30, %32 : vector<8x128xf32>
    %34 = arith.truncf %33 : vector<8x128xf32> to vector<8x128xbf16>
    %cst_24 = arith.constant 0.000000e+00 : bf16
    %35 = vector.broadcast %cst_24 : bf16 to vector<8x128xbf16>
    %36 = arith.maximumf %34, %35 : vector<8x128xbf16>
    %c0_25 = arith.constant 0 : index
    %c0_26 = arith.constant 0 : index
    %37 = vector.load %arg10[%c0_25, %c0_26] : memref<128x128xbf16, #tpu.memory_space<vmem>>, vector<128x128xbf16>
    %cst_27 = arith.constant dense<0.000000e+00> : vector<8x128xf32>
    %38 = tpu.matmul %36, %37, %cst_27 {dimension_numbers = #tpu.dot_dimension_numbers<[1], [0], [0], [1], [0, 0, 1, 1], [], []>} : vector<8x128xbf16>, vector<128x128xbf16>, vector<8x128xf32> -> vector<8x128xf32>
    %c0_28 = arith.constant 0 : index
    %c0_29 = arith.constant 0 : index
    %39 = vector.load %arg11[%c0_28, %c0_29] : memref<1x128xf32, #tpu.memory_space<vmem>>, vector<1x128xf32>
    %40 = vector.broadcast %39 : vector<1x128xf32> to vector<8x128xf32>
    %41 = arith.addf %38, %40 : vector<8x128xf32>
    %42 = tpu.iota {dimensions = array<i32: 1>} : vector<8x128xi32>
    %c6_i32 = arith.constant 6 : i32
    %43 = vector.broadcast %c6_i32 : i32 to vector<8x128xi32>
    %44 = arith.cmpi slt, %42, %43 : vector<8x128xi32>
    %cst_30 = arith.constant -1.000000e+30 : f32
    %45 = vector.broadcast %cst_30 : f32 to vector<8x128xf32>
    %46 = arith.select %44, %41, %45 : vector<8x128xi1>, vector<8x128xf32>
    %cst_31 = arith.constant dense<0xFF800000> : vector<8xf32>
    %47 = vector.multi_reduction <maximumf>, %46, %cst_31 [1] : vector<8x128xf32> to vector<8xf32>
    %48 = vector.shape_cast %47 : vector<8xf32> to vector<8x1xf32>
    %49 = vector.broadcast %48 : vector<8x1xf32> to vector<8x128xf32>
    %50 = arith.subf %46, %49 : vector<8x128xf32>
    %51 = math.exp %50 : vector<8x128xf32>
    %cst_32 = arith.constant dense<0.000000e+00> : vector<8xf32>
    %52 = vector.multi_reduction <add>, %51, %cst_32 [1] : vector<8x128xf32> to vector<8xf32>
    %53 = vector.shape_cast %52 : vector<8xf32> to vector<8x1xf32>
    %54 = math.log %53 : vector<8x1xf32>
    %55 = vector.broadcast %54 : vector<8x1xf32> to vector<8x128xf32>
    %56 = arith.subf %50, %55 : vector<8x128xf32>
    %c0_33 = arith.constant 0 : index
    %c0_34 = arith.constant 0 : index
    %57 = vector.load %arg12[%c0_33, %c0_34] : memref<8x128xf32, #tpu.memory_space<vmem>>, vector<8x128xf32>
    tpu.vector_store %arg12[%c0_33, %c0_34], %56 {strides = array<i32>} : memref<8x128xf32, #tpu.memory_space<vmem>>, vector<8x128xf32>,
    return
  }
  func.func @transform_0(%arg0: i32) -> (i32, i32) {
    %c0_i32 = arith.constant 0 : i32
    %c0_i32_0 = arith.constant 0 : i32
    return %arg0, %c0_i32 : i32, i32
  }
  func.func @transform_1(%arg0: i32) -> (i32, i32) {
    %c0_i32 = arith.constant 0 : i32
    %c0_i32_0 = arith.constant 0 : i32
    %c0_i32_1 = arith.constant 0 : i32
    return %c0_i32, %c0_i32_0 : i32, i32
  }
  func.func @transform_2(%arg0: i32) -> (i32, i32) {
    %c0_i32 = arith.constant 0 : i32
    %c0_i32_0 = arith.constant 0 : i32
    %c0_i32_1 = arith.constant 0 : i32
    return %c0_i32, %c0_i32_0 : i32, i32
  }
  func.func @transform_3(%arg0: i32) -> (i32, i32) {
    %c0_i32 = arith.constant 0 : i32
    %c0_i32_0 = arith.constant 0 : i32
    %c0_i32_1 = arith.constant 0 : i32
    return %c0_i32, %c0_i32_0 : i32, i32
  }
  func.func @transform_4(%arg0: i32) -> (i32, i32) {
    %c0_i32 = arith.constant 0 : i32
    %c0_i32_0 = arith.constant 0 : i32
    %c0_i32_1 = arith.constant 0 : i32
    return %c0_i32, %c0_i32_0 : i32, i32
  }
  func.func @transform_5(%arg0: i32) -> (i32, i32) {
    %c0_i32 = arith.constant 0 : i32
    %c0_i32_0 = arith.constant 0 : i32
    %c0_i32_1 = arith.constant 0 : i32
    return %c0_i32, %c0_i32_0 : i32, i32
  }
  func.func @transform_6(%arg0: i32) -> (i32, i32) {
    %c0_i32 = arith.constant 0 : i32
    %c0_i32_0 = arith.constant 0 : i32
    %c0_i32_1 = arith.constant 0 : i32
    return %c0_i32, %c0_i32_0 : i32, i32
  }
  func.func @transform_7(%arg0: i32) -> (i32, i32) {
    %c0_i32 = arith.constant 0 : i32
    %c0_i32_0 = arith.constant 0 : i32
    %c0_i32_1 = arith.constant 0 : i32
    return %c0_i32, %c0_i32_0 : i32, i32
  }
  func.func @transform_8(%arg0: i32) -> (i32, i32) {
    %c0_i32 = arith.constant 0 : i32
    %c0_i32_0 = arith.constant 0 : i32
    %c0_i32_1 = arith.constant 0 : i32
    return %c0_i32, %c0_i32_0 : i32, i32
  }
  func.func @transform_9(%arg0: i32) -> (i32, i32) {
    %c0_i32 = arith.constant 0 : i32
    %c0_i32_0 = arith.constant 0 : i32
    %c0_i32_1 = arith.constant 0 : i32
    return %c0_i32, %c0_i32_0 : i32, i32
  }
  func.func @transform_10(%arg0: i32) -> (i32, i32) {
    %c0_i32 = arith.constant 0 : i32
    %c0_i32_0 = arith.constant 0 : i32
    %c0_i32_1 = arith.constant 0 : i32
    return %c0_i32, %c0_i32_0 : i32, i32
  }
  func.func @transform_11(%arg0: i32) -> (i32, i32) {
    %c0_i32 = arith.constant 0 : i32
    %c0_i32_0 = arith.constant 0 : i32
    return %arg0, %c0_i32 : i32, i32
  }
}

</mosaic_0001>

<bundles_post_ra>
// kernel: tpu_custom_call.1
= control target key start
LH: loop header
LB: loop body
LE: loop exit
PB: predicated region body
PF: predicated region fallthrough
CT: control target
= control target key end

     0   :  { %6 = vsyncpa [#allocation3], 0  ;;  %s448_s0 = inlined_call_operand.hbm [shape: f32[8,128], index: 0, kind: input, shape index: {}]   ;;  %s449_s1 = inlined_call_operand.hbm [shape: f32[16,128], index: 1, kind: output, shape index: {}]  }
   0x1   :  { %7 = vsyncpa [#allocation4], 0 }
   0x2   :  { %9 = vsyncpa [#allocation4 + $0x1], 0  ;;  %s348_s6 = smov 0   ;;  %s350_s7 = smov 0  }
   0x3   :  { %s352_s8 = smov 0   ;;  %s354_s9 = smov 0  }
   0x4 LB: > { %s369_s10 = sadd.s32 4294967295, %s334_s9   ;;  %s184_s11 = sadd.s32 4294967294, %s334_s9   ;;  %s334_s9 = sphi %s354_s9, %s457_s9   ;;  %s330_s8 = sphi %s352_s8, %s456_s8   ;;  %s326_s7 = sphi %s350_s7, %s455_s7   ;;  %s322_s6 = sphi %s348_s6, %s454_s6  }
   0x5   : > { %s373_s12 = sadd.s32 1, %s334_s9   ;;  %s43_s13 = sadd.s32 1, %s330_s8 }
   0x6   : > { %s40_s14 = ssub.s32 %s334_s9, %s373_s12  ;;  %p53_p0 = scmp.ne.s32.totalorder %s330_s8, %s326_s7 }
   0x7   : > { %p41_p1 = scmp.eq.s32.totalorder %s40_s14, 0  ;;  %p54_p2 = scmp.eq.s32.totalorder %s369_s10, 1 }
   0x8   : > { %p59_p3 = scmp.ne.s32.totalorder %s326_s7, %s322_s6  ;;  %p60_p4 = scmp.eq.s32.totalorder %s184_s11, 1 }
   0x9   : > { %s384_s15 = scalar_select %p41_p1, %s330_s8, %s43_s13  }
   0xa   : > { %p386_p5 = por %p54_p2, %p53_p0  ;;  %p390_p6 = por %p60_p4, %p59_p3 }
   0xb   : > { %p185_p7 = scmp.ge.s32.totalorder %s334_s9, 1  ;;  %p67_p8 = scmp.lt.s32.totalorder %s334_s9, 3 }
   0xc   : > { %s451_s17 = scalar_select %p390_p6, 1, 0 }
   0xd   : > { %p208_p9 = scmp.eq.s32.totalorder %s369_s10, 0  ;;  %p397_p10 = pnand %p185_p7, %p67_p8 }
   0xe   : > { %s336_s19 = smov [#allocation2]  }
   0xf   : > { %s80_s20 = sshll.u32 %s336_s19, 4  ;;  %p200_p11 = pneg %p397_p10  ;;  %s81_s20 = int_to_ptr.vmem [resolvable:$true] %s80_s20 }
  0x10   : > { %s255_s21 = scalar_lea.vmem %s81_s20, 128  ;;  %p263_p3 = scmp.lt.s32.totalorder %s81_s20, %s81_s20 }
  0x11   : > { %p201_p12 = pnand %p208_p9, %p200_p11  ;;  %p256_p0 = scmp.ne.s32.totalorder %s81_s20, %s255_s21 }
  0x12   : > { %p264_p4 = scmp.lt.s32.totalorder %s255_s21, %s255_s21 }
  0x13   : > { %p246_p13 = pneg %p201_p12 }
  0x14   : > { %p265_p6 = por %p264_p4, %p263_p3 }
  0x15   : > { %p258_p1 = pnand %p256_p0, %p246_p13 }
  0x17   : > { %p259_p2 = pneg %p258_p1 }
  0x19   : > { %p266_p7 = pnand %p265_p6, %p259_p2 }
  0x1b   : > { %269 = shalt.err (!%p266_p7)
}
  0x1c   : > { %203 = dma.hbm_to_vmem [thread:$0]  (!%p201_p12), %s448_s0, 128, %s81_s20, [#allocation3]  }
  0x1d   : > { %93 = sbr.rel (%p397_p10) target bundleno = 60 (0x3c), region = 24 }
  0x22   : > { %313 = dma.done.wait (%p208_p9), [#allocation3], 128  }
  0x23   : > { %315 = vsyncadd (%p208_p9), [#allocation3], 4294967168  ;;  %s105_s24 = sand.u32 1, %s326_s7   ;;  %s191_s28 = sshll.u32 %s369_s10, 7  ;;  %v108_v0 = vld [vmem:[#allocation2] sm:$0xff] }
  0x24   : > { %s189_s25 = sshll.u32 %s105_s24, 3  ;;  %v109_v1 = vadd.f32 1.0, %v108_v0  ;;  %s123_s2 = scalar_lea.hbm %s449_s1, %s191_s28 }
  0x25   : > { %s107_s26 = scalar_lea.vmem [#allocation5], %s189_s25  ;;  %s112_s3 = scalar_lea.sflag [#allocation4], %s105_s24 }
  0x26   : > { %s125_s27 = sshll.u32 %s107_s26, 4  ;;  %110 = vst [vmem:[%s107_s26] sm:$0xff] %v109_v1  ;;  %s337_s5 = smov [#allocation5]   ;;  %s126_s27 = int_to_ptr.vmem [resolvable:$true] %s125_s27 }
  0x27   : > { %s270_s4 = scalar_lea.vmem %s126_s27, 128  ;;  %s274_s11 = sshll.u32 %s337_s5, 4  ;;  %s275_s11 = int_to_ptr.vmem [resolvable:$false] %s274_s11 }
  0x28   : > { %p271_p6 = scmp.ne.s32.totalorder %s126_s27, %s270_s4  ;;  %s276_s13 = scalar_lea.vmem %s275_s11, 256 }
  0x29   : > { %p277_p10 = scmp.lt.s32.totalorder %s126_s27, %s275_s11  ;;  %p278_p11 = scmp.lt.s32.totalorder %s276_s13, %s270_s4 }
  0x2a   : > { %p272_p8 = pnand %p271_p6, %p386_p5 }
  0x2b   : > { %p279_p12 = por %p278_p11, %p277_p10 }
  0x2c   : > { %p273_p9 = pneg %p272_p8 }
  0x2e   : > { %p280_p13 = pnand %p279_p12, %p273_p9 }
  0x30   : > { %283 = shalt.err (!%p280_p13)
}
  0x31   : > { %s284_s10 = scalar_lea.hbm %s123_s2, 128  ;;  %s288_s19 = scalar_lea.hbm %s449_s1, 256 }
  0x32   : > { %p285_p0 = scmp.ne.s32.totalorder %s123_s2, %s284_s10  ;;  %p289_p3 = scmp.lt.s32.totalorder %s123_s2, %s449_s1 }
  0x33   : > { %p290_p4 = scmp.lt.s32.totalorder %s288_s19, %s284_s10 }
  0x34   : > { %p286_p1 = pnand %p285_p0, %p386_p5 }
  0x35   : > { %p291_p7 = por %p290_p4, %p289_p3 }
  0x36   : > { %p287_p2 = pneg %p286_p1 }
  0x38   : > { %p292_p6 = pnand %p291_p7, %p287_p2 }
  0x3a   : > { %295 = shalt.err (!%p292_p6)
}
  0x3b   : > { %198 = dma.vmem_to_hbm [thread:$0]  (%p386_p5), %s126_s27, 128, %s123_s2, %s112_s3  }
  0x3c PF: > { %p210_p8 = scmp.ge.s32.totalorder %s334_s9, 2  ;;  %s137_s22 = sand.u32 1, %s322_s6  }
  0x3d   : > { %p453_p9 = scmp.ne.s32.totalorder %s451_s17, 0  ;;  %s138_s23 = scalar_lea.sflag [#allocation4], %s137_s22 }
  0x3f   : > { %p205_p10 = pnand %p210_p8, %p453_p9 }
  0x41   : > { %p206_p11 = pneg %p205_p10 }
  0x43   : > { %317 = dma.done.wait (%p206_p11), %s138_s23, 128  }
  0x44   : > { %319 = vsyncadd (%p206_p11), %s138_s23, 4294967168  ;;  %p12_p12 = scmp.ge.s32.totalorder %s373_s12, 4   ;;  %s454_s6 = smov %s326_s7 }
  0x45   : > { %s455_s7 = smov %s330_s8  ;;  %s456_s8 = smov %s384_s15 }
  0x46   : > { %s457_s9 = smov %s373_s12  ;;  %14 = sbr.rel (!%p12_p12) target bundleno = 4 (0x4), region = 61 }
  0x4b   :  { %143 = vsyncpa [#allocation3], 1 }
  0x4c   :  { %145 = vsyncpa [#allocation3 + $0x1], 1 }
  0x4d   :  { %146 = vsyncpa [#allocation4], 1 }
  0x4e   :  { %148 = vsyncpa [#allocation4 + $0x1], 1 }

// kernel: tpu_custom_call.1
= control target key start
LH: loop header
LB: loop body
LE: loop exit
PB: predicated region body
PF: predicated region fallthrough
CT: control target
= control target key end

     0   :  { %s2217_s0 = inlined_call_operand.hbm [shape: f32[16,256], index: 0, kind: input, shape index: {}]   ;;  %s2218_s1 = inlined_call_operand.hbm [shape: bf16[256,128], index: 1, kind: input, shape index: {}]   ;;  %s2219_s2 = inlined_call_operand.vmem [shape: f32[1,128], index: 2, kind: input, shape index: {}]   ;;  %s2220_s3 = inlined_call_operand.hbm [shape: bf16[128,128], index: 3, kind: input, shape index: {}]   ;;  %s2221_s4 = inlined_call_operand.vmem [shape: f32[1,128], index: 4, kind: input, shape index: {}]   ;;  %s2222_s5 = inlined_call_operand.hbm [shape: bf16[128,128], index: 5, kind: input, shape index: {}]   ;;  %s2223_s6 = inlined_call_operand.vmem [shape: f32[1,128], index: 6, kind: input, shape index: {}]   ;;  %s2224_s7 = inlined_call_operand.hbm [shape: bf16[128,128], index: 7, kind: input, shape index: {}]   ;;  %s2225_s8 = inlined_call_operand.vmem [shape: f32[1,128], index: 8, kind: input, shape index: {}]   ;;  %s2226_s9 = inlined_call_operand.hbm [shape: bf16[128,128], index: 9, kind: input, shape index: {}]   ;;  %s2227_s10 = inlined_call_operand.vmem [shape: f32[1,128], index: 10, kind: input, shape index: {}]   ;;  %s2228_s11 = inlined_call_operand.hbm [shape: f32[16,128], index: 11, kind: output, shape index: {}]  }
   0x1   :  { %2233 = sst [smem:[#allocation20_spill]] %s2218_s1 }
   0x2   :  { %2234 = sst [smem:[#allocation21_spill]] %s2220_s3 }
   0x3   :  { %2235 = sst [smem:[#allocation22_spill]] %s2222_s5 }
   0x4   :  { %2236 = sst [smem:[#allocation23_spill]] %s2224_s7 }
   0x5   :  { %2237 = sst [smem:[#allocation24_spill]] %s2226_s9 }
   0x6   :  { %16 = vsyncpa [#allocation3], 0 }
   0x7   :  { %18 = vsyncpa [#allocation3 + $0x1], 0 }
   0x8   :  { %19 = vsyncpa [#allocation6], 0 }
   0x9   :  { %20 = vsyncpa [#allocation9], 0 }
   0xa   :  { %21 = vsyncpa [#allocation12], 0 }
   0xb   :  { %22 = vsyncpa [#allocation4], 0 }
   0xc   :  { %24 = vsyncpa [#allocation4 + $0x1], 0  ;;  %s1934_s17 = smov 0   ;;  %s1936_s18 = smov 0  }
   0xd   :  { %s1938_s19 = smov 0   ;;  %s1940_s20 = smov 0  }
   0xe LB: > { %s1862_s21 = smov [#allocation5]   ;;  %s1955_s23 = sadd.s32 4294967295, %s1860_s20   ;;  %s1860_s20 = sphi %s1940_s20, %s2266_s20   ;;  %s1856_s19 = sphi %s1938_s19, %s2265_s19   ;;  %s1852_s18 = sphi %s1936_s18, %s2264_s18   ;;  %s1848_s17 = sphi %s1934_s17, %s2263_s17  }
   0xf   : > { %s309_s22 = sshll.u32 %s1862_s21, 4  ;;  %p1258_p0 = scmp.ge.s32.totalorder %s1860_s20, 1  ;;  %s310_s22 = int_to_ptr.vmem [resolvable:$true] %s309_s22 }
  0x10   : > { %p2229_p1 = scmp.eq.s32.totalorder %s1955_s23, 0  ;;  %p297_p2 = scmp.lt.s32.totalorder %s1860_s20, 3 }
  0x11   : > { %s1863_s25 = smov [#allocation8]   ;;  %s1864_s28 = smov [#allocation7]  }
  0x12   : > { %p1960_p3 = pnand %p1258_p0, %p297_p2  ;;  %s341_s26 = sshll.u32 %s1863_s25, 4  ;;  %s1973_s26 = int_to_ptr.vmem [resolvable:$true] %s341_s26 }
  0x13   : > { %s325_s29 = sshll.u32 %s1864_s28, 4  ;;  %s1637_s12 = scalar_lea.vmem %s310_s22, 2048  ;;  %s1975_s29 = int_to_ptr.vmem [resolvable:$true] %s325_s29 }
  0x14   : > { %s2238_s24 = scalar_select %p1960_p3, 1, 0 }
  0x15   : > { %p1496_p5 = pneg %p1960_p3  ;;  %p1638_p8 = scmp.ne.s32.totalorder %s310_s22, %s1637_s12 }
  0x16   : > { %p1645_p11 = scmp.lt.s32.totalorder %s310_s22, %s310_s22  ;;  %p1646_p12 = scmp.lt.s32.totalorder %s1637_s12, %s1637_s12 }
  0x17   : > { %p1969_p6 = pnand %p1496_p5, %p2229_p1 }
  0x18   : > { %p1647_p13 = por %p1646_p12, %p1645_p11 }
  0x19   : > { %p1979_p7 = pneg %p1969_p6 }
  0x1b   : > { %p1640_p9 = pnand %p1638_p8, %p1979_p7 }
  0x1d   : > { %p1641_p10 = pneg %p1640_p9 }
  0x1f   : > { %p1648_p0 = pnand %p1647_p13, %p1641_p10 }
  0x21   : > { %1651 = shalt.err (!%p1648_p0)
}
  0x22   : > { %s1865_s13 = smov 64   ;;  %s1866_s14 = smov 4  }
  0x23   : > { %s2241_s1 = sld [smem:[#allocation20_spill]]  ;;  %s1663_s21 = scalar_lea.vmem %s1973_s26, 1024 }
  0x24   : > { %p1664_p2 = scmp.ne.s32.totalorder %s1973_s26, %s1663_s21  ;;  %p1671_p9 = scmp.lt.s32.totalorder %s1973_s26, %s1973_s26 }
  0x25   : > { %p1672_p10 = scmp.lt.s32.totalorder %s1663_s21, %s1663_s21 }
  0x26   : > { %p1666_p5 = pnand %p1664_p2, %p1979_p7 }
  0x27   : > { %p1673_p11 = por %p1672_p10, %p1671_p9 }
  0x28   : > { %p1667_p8 = pneg %p1666_p5 }
  0x29   : > { %1499 = dma.hbm_to_vmem [thread:$0]  (!%p1969_p6), %s2241_s1, 2048, %s310_s22, [#allocation6], %s1865_s13, %s1865_s13, %s1866_s14  }
  0x2a   : > { %p1674_p12 = pnand %p1673_p11, %p1667_p8 }
  0x2c   : > { %1677 = shalt.err (!%p1674_p12)
}
  0x2d   : > { %s2242_s5 = sld [smem:[#allocation22_spill]]  ;;  %s1689_s22 = scalar_lea.vmem %s1975_s29, 1024 }
  0x2e   : > { %p1690_p13 = scmp.ne.s32.totalorder %s1975_s29, %s1689_s22  ;;  %p1697_p5 = scmp.lt.s32.totalorder %s1975_s29, %s1975_s29 }
  0x2f   : > { %p1698_p8 = scmp.lt.s32.totalorder %s1689_s22, %s1689_s22 }
  0x30   : > { %p1692_p0 = pnand %p1690_p13, %p1979_p7 }
  0x31   : > { %p1699_p9 = por %p1698_p8, %p1697_p5 }
  0x32   : > { %p1693_p2 = pneg %p1692_p0 }
  0x33   : > { %1505 = dma.hbm_to_vmem [thread:$0]  (!%p1969_p6), %s2242_s5, 1024, %s1973_s26, [#allocation9], %s1865_s13, %s1865_s13, %s1866_s14  }
  0x34   : > { %p1700_p10 = pnand %p1699_p9, %p1693_p2 }
  0x36   : > { %1703 = shalt.err (!%p1700_p10)
}
  0x37   : > { %s2243_s3 = sld [smem:[#allocation21_spill]]  ;;  %s1867_s26 = smov [#allocation10]  }
  0x38   : > { %s357_s16 = sshll.u32 %s1867_s26, 4  ;;  %s1868_s21 = smov [#allocation11]   ;;  %s358_s16 = int_to_ptr.vmem [resolvable:$true] %s357_s16 }
  0x39   : > { %s373_s25 = sshll.u32 %s1868_s21, 4  ;;  %s1715_s28 = scalar_lea.vmem %s358_s16, 1024  ;;  %s374_s25 = int_to_ptr.vmem [resolvable:$true] %s373_s25 }
  0x3a   : > { %p1716_p11 = scmp.ne.s32.totalorder %s358_s16, %s1715_s28  ;;  %p1723_p0 = scmp.lt.s32.totalorder %s358_s16, %s358_s16 }
  0x3b   : > { %p1724_p2 = scmp.lt.s32.totalorder %s1715_s28, %s1715_s28 }
  0x3c   : > { %p1718_p12 = pnand %p1716_p11, %p1979_p7 }
  0x3d   : > { %1502 = dma.hbm_to_vmem [thread:$0]  (!%p1969_p6), %s2243_s3, 1024, %s1975_s29, [#allocation6], %s1865_s13, %s1865_s13, %s1866_s14  }
  0x3e   : > { %p1719_p13 = pneg %p1718_p12  ;;  %p1725_p5 = por %p1724_p2, %p1723_p0 }
  0x40   : > { %p1726_p8 = pnand %p1725_p5, %p1719_p13 }
  0x42   : > { %1729 = shalt.err (!%p1726_p8)
}
  0x43   : > { %s2244_s7 = sld [smem:[#allocation23_spill]]  ;;  %s1741_s12 = scalar_lea.vmem %s374_s25, 1024 }
  0x44   : > { %p1742_p9 = scmp.ne.s32.totalorder %s374_s25, %s1741_s12  ;;  %p1749_p12 = scmp.lt.s32.totalorder %s374_s25, %s374_s25 }
  0x45   : > { %p1750_p0 = scmp.lt.s32.totalorder %s1741_s12, %s1741_s12 }
  0x46   : > { %p1744_p10 = pnand %p1742_p9, %p1979_p7 }
  0x47   : > { %p1751_p13 = por %p1750_p0, %p1749_p12 }
  0x48   : > { %p1745_p11 = pneg %p1744_p10 }
  0x49   : > { %1508 = dma.hbm_to_vmem [thread:$0]  (!%p1969_p6), %s2244_s7, 1024, %s358_s16, [#allocation9], %s1865_s13, %s1865_s13, %s1866_s14  }
  0x4a   : > { %p1752_p2 = pnand %p1751_p13, %p1745_p11 }
  0x4c   : > { %1755 = shalt.err (!%p1752_p2)
}
  0x4d   : > { %s2245_s9 = sld [smem:[#allocation24_spill]]  ;;  %s1257_s27 = sadd.s32 4294967294, %s1860_s20  }
  0x4e   : > { %s2045_s30 = sadd.s32 1, %s1860_s20   ;;  %s37_s16 = sadd.s32 1, %s1856_s19 }
  0x4f   : > { %s34_s21 = ssub.s32 %s1860_s20, %s2045_s30  ;;  %p44_p7 = scmp.ne.s32.totalorder %s1856_s19, %s1852_s18 }
  0x50   : > { %p35_p5 = scmp.eq.s32.totalorder %s34_s21, 0  ;;  %p45_p8 = scmp.eq.s32.totalorder %s1860_s20, 0 }
  0x51   : > { %p50_p9 = scmp.ne.s32.totalorder %s1852_s18, %s1848_s17  ;;  %p284_p10 = scmp.eq.s32.totalorder %s1955_s23, 1 }
  0x52   : > { %s2057_s28 = scalar_select %p35_p5, %s1856_s19, %s37_s16  }
  0x53   : > { %1511 = dma.hbm_to_vmem [thread:$0]  (!%p1969_p6), %s2245_s9, 1024, %s374_s25, [#allocation12], %s1865_s13, %s1865_s13, %s1866_s14  }
  0x54   : > { %2246 = sst [smem:[#allocation19_spill]] %s2057_s28  ;;  %p46_p11 = por %p45_p8, %p44_p7 }
  0x55   : > { %p2061_p12 = por %p2229_p1, %p50_p9  ;;  %p2065_p6 = por %p284_p10, %p44_p7 }
  0x56   : > { %p290_p0 = scmp.eq.s32.totalorder %s1257_s27, 1  ;;  %p1525_p13 = scmp.lt.s32.totalorder %s1860_s20, 2 }
  0x57   : > { %s2247_s29 = scalar_select %p2061_p12, 1, 0 }
  0x58   : > { %s2248_s13 = scalar_select %p2065_p6, 1, 0 }
  0x59   : > { %s390_s14 = sand.u32 1, %s1856_s19   ;;  %p2071_p2 = por %p290_p0, %p50_p9 }
  0x5a   : > { %s1265_s22 = sshll.u32 %s390_s14, 4  ;;  %s1333_s12 = sshll.u32 %s1860_s20, 8 }
  0x5b   : > { %s2249_s25 = scalar_select %p2071_p2, 1, 0 }
  0x5c   : > { %s2079_s16 = scalar_lea.hbm %s2217_s0, %s1333_s12  ;;  %s394_s21 = scalar_lea.vmem [#allocation2], %s1265_s22 }
  0x5d   : > { %s402_s1 = sshll.u32 %s394_s21, 4  ;;  %p2081_p7 = pnand %p1525_p13, %p46_p11  ;;  %s403_s1 = int_to_ptr.vmem [resolvable:$true] %s402_s1 }
  0x5e   : > { %s391_s3 = scalar_lea.sflag [#allocation3], %s390_s14  ;;  %s1756_s5 = scalar_lea.hbm %s2079_s16, 256 }
  0x5f   : > { %p1757_p5 = scmp.ne.s32.totalorder %s2079_s16, %s1756_s5  ;;  %p1758_p8 = pneg %p2081_p7 }
  0x60   : > { %s1761_s26 = scalar_lea.hbm %s2217_s0, 512  ;;  %p1762_p11 = scmp.lt.s32.totalorder %s2079_s16, %s2217_s0 }
  0x61   : > { %p1759_p9 = pnand %p1758_p8, %p1757_p5  ;;  %p1763_p0 = scmp.lt.s32.totalorder %s1761_s26, %s1756_s5 }
  0x63   : > { %p1760_p10 = pneg %p1759_p9  ;;  %p1764_p13 = por %p1763_p0, %p1762_p11 }
  0x65   : > { %p1765_p4 = pnand %p1764_p13, %p1760_p10 }
  0x67   : > { %1768 = shalt.err (!%p1765_p4)
}
  0x68   : > { %s1769_s21 = scalar_lea.vmem %s403_s1, 256  ;;  %s1869_s14 = smov [#allocation2]  }
  0x69   : > { %p1770_p1 = scmp.ne.s32.totalorder %s403_s1, %s1769_s21  ;;  %s1774_s9 = sshll.u32 %s1869_s14, 4  ;;  %s1775_s9 = int_to_ptr.vmem [resolvable:$false] %s1774_s9 }
  0x6a   : > { %s1776_s28 = scalar_lea.vmem %s1775_s9, 512  ;;  %p1777_p5 = scmp.lt.s32.totalorder %s403_s1, %s1775_s9 }
  0x6b   : > { %p1772_p2 = pnand %p1770_p1, %p1758_p8  ;;  %p1778_p9 = scmp.lt.s32.totalorder %s1776_s28, %s1769_s21 }
  0x6d   : > { %p1773_p6 = pneg %p1772_p2  ;;  %p1779_p12 = por %p1778_p9, %p1777_p5 }
  0x6f   : > { %p1780_p3 = pnand %p1779_p12, %p1773_p6 }
  0x71   : > { %1783 = shalt.err (!%p1780_p3)
}
  0x72   : > { %1515 = dma.hbm_to_vmem [thread:$0]  (!%p2081_p7), %s2079_s16, 256, %s403_s1, %s391_s3  }
  0x73   : > { %p2251_p10 = scmp.ne.s32.totalorder %s2238_s24, 0 }
  0x74   : > { %s2102_s5 = sand.u32 (!%p2251_p10), 1, %s1852_s18   ;;  %p2252_p1 = scmp.ne.s32.totalorder (!%p2251_p10), %s2247_s29, 0 }
  0x75   : > { %411 = sbr.rel (%p2251_p10) target bundleno = 1487 (0x5cf), region = 64  ;;  %s1269_s7 = sshll.u32 (!%p2251_p10), %s2102_s5, 4 }
  0x76   : > { %s414_s12 = scalar_lea.sflag (!%p2251_p10), [#allocation3], %s2102_s5  ;;  %s2106_s9 = scalar_lea.vmem (!%p2251_p10), [#allocation2], %s1269_s7 }
  0x7a   : > { %1827 = dma.done.wait (%p2252_p1), %s414_s12, 256  }
  0x7b   : > { %1829 = vsyncadd (%p2252_p1), %s414_s12, 4294967040  ;;  %p2253_p3 = scmp.eq.s32.totalorder %s1955_s23, 0 }
  0x7d   : > { %1831 = dma.done.wait (%p2253_p3), [#allocation6], 3072   ;;  %p2254_p4 = pmov %p2253_p3 }
  0x7e   : > { %p2255_p12 = pmov %p2253_p3 }
  0x7f   : > { %1833 = vsyncadd (%p2254_p4), [#allocation6], 4294964224 }
  0x80   : > { %1835 = dma.done.wait (%p2255_p12), [#allocation9], 2048   ;;  %p2256_p6 = pmov %p2253_p3 }
  0x81   : > { %p2257_p2 = pmov %p2253_p3 }
  0x82   : > { %1837 = vsyncadd (%p2256_p6), [#allocation9], 4294965248 }
  0x83   : > { %1839 = dma.done.wait (%p2257_p2), [#allocation12], 1024   ;;  %p2258_p7 = pmov %p2257_p2 }
  0x84   : > { %v1870_v0 = vmov 0.0   ;;  %v1574_v1 = vld [vmem:[#allocation5 + $0x78] sm:$0xff]   ;;  %v1576_v3 = vld [vmem:[#allocation5 + $0x70] sm:$0xff]   ;;  %v1578_v5 = vld [vmem:[#allocation5 + $0x68] sm:$0xff]   ;;  %vm1871_vm0 = vmmov 0   ;;  %v1872_v59 = vmov 0  }
  0x85   : > { %1841 = vsyncadd (%p2258_p7), [#allocation12], 4294966272  ;;  %1392 = vmatprep.subr.bf16.mxu1 %v1870_v0  ;;  %v1575_v2 = vld [vmem:[#allocation5 + $0x38] sm:$0xff]   ;;  %1334 = vmatprep.subr.bf16.mxu0 %v1574_v1  ;;  %v1577_v4 = vld [vmem:[#allocation5 + $0x30] sm:$0xff]   ;;  %s1275_s21 = sshll.u32 %s2102_s5, 3  ;;  %s1330_s14 = sshll.u32 %s1955_s23, 7 }
  0x86   : > { %1335 = vmatpush3.bf16.msra.mxu0 %v1575_v2  ;;  %v1579_v6 = vld [vmem:[#allocation5 + $0x28] sm:$0xff]   ;;  %v1580_v7 = vld [vmem:[#allocation5 + $0x60] sm:$0xff]   ;;  %v1582_v9 = vld [vmem:[#allocation5 + $0x58] sm:$0xff]   ;;  %1408 = vmatprep.mubr.msk.bf16.mxu1 %vm1871_vm0, %v1870_v0  ;;  %s475_s7 = scalar_lea.vmem [#allocation13], %s1275_s21  ;;  %s1137_s3 = scalar_lea.hbm %s2228_s11, %s1330_s14 }
  0x87   : > { %1336 = vmatprep.subr.bf16.mxu0 %v1576_v3  ;;  %v1581_v8 = vld [vmem:[#allocation5 + $0x20] sm:$0xff]   ;;  %v1583_v10 = vld [vmem:[#allocation5 + $0x18] sm:$0xff]   ;;  %v1584_v11 = vld [vmem:[#allocation5 + $0x50] sm:$0xff]   ;;  %s1139_s12 = sshll.u32 %s475_s7, 4  ;;  %s1126_s24 = scalar_lea.sflag [#allocation4], %s2102_s5  ;;  %s1140_s12 = int_to_ptr.vmem [resolvable:$true] %s1139_s12 }
  0x88   : > { %v478_v12 = vld [vmem:[%s2106_s9 + $0x8] sm:$0xff]  ;;  %v1585_v15 = vld [vmem:[#allocation5 + $0x10] sm:$0xff]   ;;  %v1588_v19 = vld [vmem:[#allocation5 + $0x40] sm:$0xff]   ;;  %s1784_s28 = scalar_lea.vmem %s1140_s12, 128  ;;  %p2259_p11 = scmp.ne.s32.totalorder %s2248_s13, 0 }
  0x89   : > { %v480_v13 = vpack.c.bf16 %v478_v12, %v478_v12  ;;  %v1590_v14 = vld [vmem:[#allocation7 + $0x38] sm:$0xff]   ;;  %v1586_v16 = vld [vmem:[#allocation5 + $0x48] sm:$0xff]   ;;  %v1591_v17 = vld [vmem:[#allocation7 + $0x30] sm:$0xff]   ;;  %p1785_p8 = scmp.ne.s32.totalorder %s1140_s12, %s1784_s28  ;;  %s1873_s29 = smov [#allocation13]  }
  0x8a   : > { %1337 = vmatpush3.bf16.msra.mxu0 %v1577_v4  ;;  %1393 = vmatpush3.bf16.msra.mxu1 %v1590_v14  ;;  %v1587_v18 = vld [vmem:[#allocation5 + $0x8] sm:$0xff]   ;;  %v1589_v21 = vld [vmem:[#allocation5] sm:$0xff]   ;;  %v1594_v25 = vld [vmem:[#allocation7 + $0x18] sm:$0xff]   ;;  %s1788_s16 = sshll.u32 %s1873_s29, 4  ;;  %s1789_s16 = int_to_ptr.vmem [resolvable:$false] %s1788_s16 }
  0x8b   : > { %1338 = vmatprep.subr.bf16.mxu0 %v1578_v5  ;;  %648 = vmatprep.mubr.bf16.mxu0 %v480_v13  ;;  %v1592_v20 = vld [vmem:[#allocation7 + $0x28] sm:$0xff]   ;;  %v477_v22 = vld [vmem:[%s2106_s9] sm:$0xff]  ;;  %v1598_v29 = vld [vmem:[#allocation8 + $0x38] sm:$0xff]   ;;  %p1786_p0 = pnand %p1785_p8, %p2259_p11  ;;  %s1790_s23 = scalar_lea.vmem %s1789_s16, 256 }
  0x8c   : > { %1394 = vmatprep.subr.bf16.mxu1 %v1870_v0  ;;  %v1593_v23 = vld [vmem:[#allocation7 + $0x20] sm:$0xff]   ;;  %v479_v24 = vpack.c.bf16 %v477_v22, %v477_v22  ;;  %v1595_v26 = vld [vmem:[#allocation7 + $0x10] sm:$0xff]   ;;  %v1596_v27 = vld [vmem:[#allocation7 + $0x8] sm:$0xff]   ;;  %p1791_p5 = scmp.lt.s32.totalorder %s1140_s12, %s1789_s16  ;;  %p1792_p9 = scmp.lt.s32.totalorder %s1790_s23, %s1784_s28 }
  0x8d   : > { %v1597_v28 = vld [vmem:[#allocation7] sm:$0xff]   ;;  %v1599_v30 = vld [vmem:[#allocation8 + $0x30] sm:$0xff]   ;;  %v1600_v31 = vld [vmem:[#allocation8 + $0x28] sm:$0xff]   ;;  %p1787_p13 = pneg %p1786_p0 }
  0x8e   : > { %1339 = vmatpush3.bf16.msra.mxu0 %v1579_v6  ;;  %1395 = vmatpush3.bf16.msra.mxu1 %v1591_v17  ;;  %v1601_v32 = vld [vmem:[#allocation8 + $0x20] sm:$0xff]   ;;  %v1602_v33 = vld [vmem:[#allocation8 + $0x18] sm:$0xff]   ;;  %v1603_v34 = vld [vmem:[#allocation8 + $0x10] sm:$0xff]   ;;  %p1793_p10 = por %p1792_p9, %p1791_p5 }
  0x8f   : > { %1340 = vmatprep.subr.bf16.mxu0 %v1580_v7  ;;  %1396 = vmatprep.subr.bf16.mxu1 %v1870_v0  ;;  %v1276_v36 = vld [vmem:[%s2219_s2] ss:$0 sm:$0xff]  ;;  %v1604_v45 = vld [vmem:[#allocation8 + $0x8] sm:$0xff]   ;;  %v1606_v47 = vld [vmem:[#allocation10 + $0x38] sm:$0xff]  }
  0x90   : > { %v1605_v46 = vld [vmem:[#allocation8] sm:$0xff]   ;;  %v1607_v48 = vld [vmem:[#allocation10 + $0x30] sm:$0xff]   ;;  %v1608_v49 = vld [vmem:[#allocation10 + $0x28] sm:$0xff]   ;;  %p1794_p1 = pnand %p1793_p10, %p1787_p13 }
  0x91   : > { %v1609_v50 = vld [vmem:[#allocation10 + $0x20] sm:$0xff]   ;;  %v1610_v51 = vld [vmem:[#allocation10 + $0x18] sm:$0xff]   ;;  %v1611_v52 = vld [vmem:[#allocation10 + $0x10] sm:$0xff]  }
  0x92   : > { %1341 = vmatpush3.bf16.msra.mxu0 %v1581_v8  ;;  %1397 = vmatpush3.bf16.msra.mxu1 %v1592_v20  ;;  %v1293_v53 = vld [vmem:[%s2221_s4] ss:$0 sm:$0xff]  ;;  %v1612_v62 = vld [vmem:[#allocation10 + $0x8] sm:$0xff]   ;;  %v1614_v1 = vld [vmem:[#allocation11 + $0x38] sm:$0xff]  }
  0x93   : > { %1342 = vmatprep.subr.bf16.mxu0 %v1582_v9  ;;  %1398 = vmatprep.subr.bf16.mxu1 %v1870_v0  ;;  %v1613_v63 = vld [vmem:[#allocation10] sm:$0xff]   ;;  %v1615_v2 = vld [vmem:[#allocation11 + $0x30] sm:$0xff]   ;;  %v1616_v3 = vld [vmem:[#allocation11 + $0x28] sm:$0xff]  }
  0x94   : > { %v1617_v4 = vld [vmem:[#allocation11 + $0x20] sm:$0xff]   ;;  %v1618_v5 = vld [vmem:[#allocation11 + $0x18] sm:$0xff]   ;;  %v1619_v6 = vld [vmem:[#allocation11 + $0x10] sm:$0xff]  }
  0x95   : > { %v1302_v7 = vld [vmem:[%s2223_s6] ss:$0 sm:$0xff] }
  0x96   : > { %1343 = vmatpush3.bf16.msra.mxu0 %v1583_v10  ;;  %1399 = vmatpush3.bf16.msra.mxu1 %v1593_v23  ;;  %v1311_v17 = vld [vmem:[%s2225_s8] ss:$0 sm:$0xff] }
  0x97   : > { %1344 = vmatprep.subr.bf16.mxu0 %v1584_v11  ;;  %1400 = vmatprep.subr.bf16.mxu1 %v1870_v0 }
  0x9a   : > { %1345 = vmatpush3.bf16.msra.mxu0 %v1585_v15  ;;  %1401 = vmatpush3.bf16.msra.mxu1 %v1594_v25  ;;  %v1620_v15 = vld [vmem:[#allocation11 + $0x8] sm:$0xff]   ;;  %v1110_v25 = vlaneseq }
  0x9b   : > { %1346 = vmatprep.subr.bf16.mxu0 %v1586_v16  ;;  %1402 = vmatprep.subr.bf16.mxu1 %v1870_v0  ;;  %v1621_v16 = vld [vmem:[#allocation11] sm:$0xff]  }
  0x9e   : > { %1347 = vmatpush3.bf16.msra.mxu0 %v1587_v18  ;;  %1403 = vmatpush3.bf16.msra.mxu1 %v1595_v26  ;;  %v1111_v26 = vand.u32 127, %v1110_v25 }
  0x9f   : > { %1348 = vmatprep.subr.bf16.mxu0 %v1588_v19  ;;  %1404 = vmatprep.subr.bf16.mxu1 %v1870_v0 }
  0xa0   : > { %vm1112_vm2 = vcmp.lt.s32.totalorder %v1111_v26, 6 }
  0xa2   : > { %1349 = vmatpush3.bf16.msra.mxu0 %v1589_v21  ;;  %1405 = vmatpush3.bf16.msra.mxu1 %v1596_v27 }
  0xa3   : > { %1412 = vmatprep.subr.bf16.mxu0 %v1870_v0  ;;  %1406 = vmatprep.subr.bf16.mxu1 %v1870_v0 }
  0xa5   : > { %649 = vmatmul.mubr.bf16.vlgmr.msra.gmra.mxu0 %v479_v24 }
  0xa6   : > { %1428 = vmatprep.mubr.msk.bf16.mxu0 %vm1871_vm0, %v1870_v0  ;;  %1407 = vmatpush3.bf16.msra.mxu1 %v1597_v28 }
  0xa7   : > { %1432 = vmatprep.subr.bf16.mxu1 %v1870_v0  ;;  %1413 = vmatpush3.bf16.msra.mxu0 %v1598_v29 }
  0xa8   : > { %1414 = vmatprep.subr.bf16.mxu0 %v1870_v0 }
  0xab   : > { %1415 = vmatpush3.bf16.msra.mxu0 %v1599_v30 }
  0xac   : > { %1416 = vmatprep.subr.bf16.mxu0 %v1870_v0 }
  0xaf   : > { %1417 = vmatpush3.bf16.msra.mxu0 %v1600_v31 }
  0xb0   : > { %1418 = vmatprep.subr.bf16.mxu0 %v1870_v0 }
  0xb3   : > { %1419 = vmatpush3.bf16.msra.mxu0 %v1601_v32 }
  0xb4   : > { %1420 = vmatprep.subr.bf16.mxu0 %v1870_v0 }
  0xb7   : > { %1421 = vmatpush3.bf16.msra.mxu0 %v1602_v33 }
  0xb8   : > { %1422 = vmatprep.subr.bf16.mxu0 %v1870_v0 }
  0xbb   : > { %1423 = vmatpush3.bf16.msra.mxu0 %v1603_v34 }
  0xbc   : > { %1424 = vmatprep.subr.bf16.mxu0 %v1870_v0 }
  0xbf   : > { %1425 = vmatpush3.bf16.msra.mxu0 %v1604_v45 }
  0xc0   : > { %1426 = vmatprep.subr.bf16.mxu0 %v1870_v0 }
  0xc3   : > { %1427 = vmatpush3.bf16.msra.mxu0 %v1605_v46 }
  0xc4   : > { %1452 = vmatprep.subr.bf16.mxu0 %v1870_v0 }
 0x165   : > { %v1350_v35 = vpop.f32.mrf.mxu0 }
 0x167   : > { %v1351_v37 = vpop.f32.mrf.mxu0 }
 0x168   : > { %v1352_v38 = vadd.f32 %v1351_v37, %v1350_v35 }
 0x169   : > { %v1353_v39 = vpop.f32.mrf.mxu0 }
 0x16a   : > { %v651_v40 = vadd.f32 %v1352_v38, %v1276_v36 }
 0x16b   : > { %v1354_v41 = vpop.f32.mrf.mxu0 }
 0x16c   : > { %v657_v42 = vmul.f32 0.01, %v651_v40  ;;  %vm656_vm1 = vcmp.gt.f32.partialorder %v651_v40, 0.0 }
 0x16e   : > { %v658_v43 = vsel %vm656_vm1, %v651_v40, %v657_v42 }
 0x16f   : > { %v659_v44 = vpack.c.bf16 %v658_v43, %v658_v43 }
 0x171   : > { %1409 = vmatmul.mubr.bf16.vlgmr.msra.gmra.mxu1 %v659_v44 }
 0x172   : > { %1448 = vmatprep.mubr.msk.bf16.mxu1 %vm1871_vm0, %v1870_v0  ;;  %1433 = vmatpush3.bf16.msra.mxu1 %v1606_v47 }
 0x173   : > { %1434 = vmatprep.subr.bf16.mxu1 %v1870_v0 }
 0x176   : > { %1435 = vmatpush3.bf16.msra.mxu1 %v1607_v48 }
 0x177   : > { %1436 = vmatprep.subr.bf16.mxu1 %v1870_v0 }
 0x17a   : > { %1437 = vmatpush3.bf16.msra.mxu1 %v1608_v49 }
 0x17b   : > { %1438 = vmatprep.subr.bf16.mxu1 %v1870_v0 }
 0x17e   : > { %1439 = vmatpush3.bf16.msra.mxu1 %v1609_v50 }
 0x17f   : > { %1440 = vmatprep.subr.bf16.mxu1 %v1870_v0 }
 0x182   : > { %1441 = vmatpush3.bf16.msra.mxu1 %v1610_v51 }
 0x183   : > { %1442 = vmatprep.subr.bf16.mxu1 %v1870_v0 }
 0x186   : > { %1443 = vmatpush3.bf16.msra.mxu1 %v1611_v52 }
 0x187   : > { %1444 = vmatprep.subr.bf16.mxu1 %v1870_v0 }
 0x18a   : > { %1445 = vmatpush3.bf16.msra.mxu1 %v1612_v62 }
 0x18b   : > { %1446 = vmatprep.subr.bf16.mxu1 %v1870_v0 }
 0x18e   : > { %1447 = vmatpush3.bf16.msra.mxu1 %v1613_v63 }
 0x231   : > { %v765_v54 = vpop.f32.mrf.mxu1 }
 0x232   : > { %v766_v55 = vadd.f32 %v1293_v53, %v765_v54 }
 0x233   : > { %v1410_v56 = vpop.f32.mrf.mxu1 }
 0x234   : > { %v771_v57 = vpack.c.bf16 %v766_v55, %v766_v55 }
 0x235   : > { %v768_v58 = vpop.f32.mrf.mxu1 }
 0x236   : > { %v772_v60 = vmax.bf16 %v1872_v59, %v771_v57 }
 0x237   : > { %v1411_v61 = vpop.f32.mrf.mxu1 }
 0x238   : > { %1429 = vmatmul.mubr.bf16.vlgmr.msra.gmra.mxu0 %v772_v60 }
 0x239   : > { %1468 = vmatprep.mubr.msk.bf16.mxu0 %vm1871_vm0, %v1870_v0  ;;  %1453 = vmatpush3.bf16.msra.mxu0 %v1614_v1 }
 0x23a   : > { %1454 = vmatprep.subr.bf16.mxu0 %v1870_v0 }
 0x23d   : > { %1455 = vmatpush3.bf16.msra.mxu0 %v1615_v2 }
 0x23e   : > { %1456 = vmatprep.subr.bf16.mxu0 %v1870_v0 }
 0x241   : > { %1457 = vmatpush3.bf16.msra.mxu0 %v1616_v3 }
 0x242   : > { %1458 = vmatprep.subr.bf16.mxu0 %v1870_v0 }
 0x245   : > { %1459 = vmatpush3.bf16.msra.mxu0 %v1617_v4 }
 0x246   : > { %1460 = vmatprep.subr.bf16.mxu0 %v1870_v0 }
 0x249   : > { %1461 = vmatpush3.bf16.msra.mxu0 %v1618_v5 }
 0x24a   : > { %1462 = vmatprep.subr.bf16.mxu0 %v1870_v0 }
 0x24d   : > { %1463 = vmatpush3.bf16.msra.mxu0 %v1619_v6 }
 0x24e   : > { %1464 = vmatprep.subr.bf16.mxu0 %v1870_v0 }
 0x251   : > { %1465 = vmatpush3.bf16.msra.mxu0 %v1620_v15 }
 0x252   : > { %1466 = vmatprep.subr.bf16.mxu0 %v1870_v0  ;;  %v1320_v0 = vld [vmem:[%s2227_s10] ss:$0 sm:$0xff] }
 0x255   : > { %1467 = vmatpush3.bf16.msra.mxu0 %v1621_v16 }
 0x2f8   : > { %v878_v8 = vpop.f32.mrf.mxu0 }
 0x2f9   : > { %v879_v9 = vadd.f32 %v1302_v7, %v878_v8 }
 0x2fa   : > { %v1430_v10 = vpop.f32.mrf.mxu0 }
 0x2fb   : > { %v884_v11 = vpack.c.bf16 %v879_v9, %v879_v9 }
 0x2fc   : > { %v881_v12 = vpop.f32.mrf.mxu0 }
 0x2fd   : > { %v885_v13 = vmax.bf16 %v1872_v59, %v884_v11 }
 0x2fe   : > { %v1431_v14 = vpop.f32.mrf.mxu0 }
 0x2ff   : > { %1449 = vmatmul.mubr.bf16.vlgmr.msra.gmra.mxu1 %v885_v13 }
 0x3bf   : > { %v991_v18 = vpop.f32.mrf.mxu1 }
 0x3c0   : > { %v992_v19 = vadd.f32 %v1311_v17, %v991_v18 }
 0x3c1   : > { %v1450_v20 = vpop.f32.mrf.mxu1 }
 0x3c2   : > { %v997_v21 = vpack.c.bf16 %v992_v19, %v992_v19 }
 0x3c3   : > { %v994_v22 = vpop.f32.mrf.mxu1 }
 0x3c4   : > { %v998_v23 = vmax.bf16 %v1872_v59, %v997_v21 }
 0x3c5   : > { %v1451_v24 = vpop.f32.mrf.mxu1 }
 0x3c6   : > { %1469 = vmatmul.mubr.bf16.vlgmr.msra.gmra.mxu0 %v998_v23 }
 0x486   : > { %v1104_v27 = vpop.f32.mrf.mxu0 }
 0x487   : > { %v1105_v28 = vadd.f32 %v1320_v0, %v1104_v27 }
 0x488   : > { %v1470_v29 = vpop.f32.mrf.mxu0 }
 0x489   : > { %v1113_v30 = vsel %vm1112_vm2, %v1105_v28, -1e+30 }
 0x48a   : > { %1114 = vmax.xlane.f32.xlu0 %v1113_v30  ;;  %v1107_v31 = vpop.f32.mrf.mxu0 }
 0x48c   : > { %v1471_v32 = vpop.f32.mrf.mxu0 }
 0x513   : > { %v1115_v33 = vpop.xlane.xlu0 %1114 }
 0x514   : > { %v1116_v34 = vsub.f32 %v1113_v30, %v1115_v33 }
 0x516   : > { %v1117_v35 = vmul.f32 1.442695, %v1116_v34 }
 0x518   : > { %1622 = vpow2.f32 %v1117_v35 }
 0x525   : > { %v1623_v36 = vpop.eup %1622 }
 0x526   : > { %1119 = vadd.xlane.f32.xlu0 %v1623_v36 }
 0x5af   : > { %v1120_v37 = vpop.xlane.xlu0 %1119 }
 0x5b0   : > { %1624 = vlog2.f32 %v1120_v37 }
 0x5bd   : > { %v1625_v38 = vpop.eup %1624 }
 0x5be   : > { %v1122_v39 = vmul.f32 0.6931472, %v1625_v38 }
 0x5c0   : > { %v1123_v40 = vsub.f32 %v1116_v34, %v1122_v39 }
 0x5c2   : > { %1124 = vst [vmem:[%s475_s7] sm:$0xff] %v1123_v40 }
 0x5c3   : > { %1797 = shalt.err (!%p1794_p1)
}
 0x5c4   : > { %s1798_s27 = scalar_lea.hbm %s1137_s3, 128  ;;  %s1802_s26 = scalar_lea.hbm %s2228_s11, 256 }
 0x5c5   : > { %p1799_p3 = scmp.ne.s32.totalorder %s1137_s3, %s1798_s27  ;;  %p1803_p6 = scmp.lt.s32.totalorder %s1137_s3, %s2228_s11 }
 0x5c6   : > { %p1804_p2 = scmp.lt.s32.totalorder %s1802_s26, %s1798_s27 }
 0x5c7   : > { %p1800_p4 = pnand %p1799_p3, %p2259_p11 }
 0x5c8   : > { %p1805_p7 = por %p1804_p2, %p1803_p6 }
 0x5c9   : > { %p1801_p12 = pneg %p1800_p4 }
 0x5cb   : > { %p1806_p8 = pnand %p1805_p7, %p1801_p12 }
 0x5cd   : > { %1809 = shalt.err (!%p1806_p8)
}
 0x5ce   : > { %1494 = dma.vmem_to_hbm [thread:$0]  (%p2259_p11), %s1140_s12, 128, %s1137_s3, %s1126_s24  }
 0x5cf PF: > { %s1151_s14 = sand.u32 1, %s1848_s17   ;;  %p2260_p0 = scmp.ne.s32.totalorder %s2249_s25, 0 }
 0x5d0   : > { %p2261_p13 = scmp.ge.s32.totalorder %s1860_s20, 2  ;;  %s1152_s7 = scalar_lea.sflag [#allocation4], %s1151_s14 }
 0x5d2   : > { %p1517_p5 = pnand %p2261_p13, %p2260_p0 }
 0x5d4   : > { %p1518_p9 = pneg %p1517_p5 }
 0x5d6   : > { %1843 = dma.done.wait (%p1518_p9), %s1152_s7, 128  }
 0x5d7   : > { %1845 = vsyncadd (%p1518_p9), %s1152_s7, 4294967168  ;;  %s2262_s9 = sld [smem:[#allocation19_spill]]  ;;  %p27_p10 = scmp.ge.s32.totalorder %s2045_s30, 4  }
 0x5d8   : > { %s2263_s17 = smov %s1852_s18  ;;  %s2264_s18 = smov %s1856_s19 }
 0x5d9   : > { %s2266_s20 = smov %s2045_s30  ;;  %29 = sbr.rel (!%p27_p10) target bundleno = 14 (0xe), region = 129 }
 0x5dd   : > { %s2265_s19 = smov %s2262_s9 }
 0x5de   :  { %1157 = vsyncpa [#allocation3], 1 }
 0x5df   :  { %1159 = vsyncpa [#allocation3 + $0x1], 1 }
 0x5e0   :  { %1160 = vsyncpa [#allocation6], 1 }
 0x5e1   :  { %1161 = vsyncpa [#allocation9], 1 }
 0x5e2   :  { %1162 = vsyncpa [#allocation12], 1 }
 0x5e3   :  { %1163 = vsyncpa [#allocation4], 1 }
 0x5e4   :  { %1165 = vsyncpa [#allocation4 + $0x1], 1 }

</bundles_post_ra>
